<compile_context>
chip_gen: v6e
topology: v6e:2x2x1
jax: 0.10.0
libtpu: 0.0.40
codegen_flags: <defaults>
</compile_context>

<pallas_src>
import functools

import jax
import jax.numpy as jnp
from jax.experimental import pallas as pl
from jax.experimental.pallas import tpu as pltpu


def _round_up(x, m):
    return ((x + m - 1) // m) * m


def _transr_kernel(d_ref, ids_ref, m_ref, out_ref, *, nr, r_pad):
    """Grid = (batch_tiles,).

    d_ref   : (K_pad, TILE_B)      bf16   augmented (h - t)^T tile (row E = 1, rest 0-pad)
    ids_ref : (1, TILE_B)          int32  relation id per sample (lane-dense)
    m_ref   : (NR*R_pad, K_pad)    bf16   flattened augmented relation table (VMEM-resident)
    out_ref : (1, TILE_B)          f32    L1 scores (lane-dense)
    """
    tile_b = d_ref.shape[-1]

    # One large MXU matmul: bf16 operands, f32 accumulation.
    proj = jnp.dot(m_ref[...], d_ref[...],
                   preferred_element_type=jnp.float32)          # (NR*R_pad, TILE_B)

    # Per-relation L1 over the relation_dim rows (sublane-axis reduction).
    s = jnp.abs(proj).reshape(nr, r_pad, tile_b).sum(axis=1)    # (NR, TILE_B)

    # One-hot select of each sample's relation, then sublane-sum to (1, TILE_B).
    rel_iota = jax.lax.broadcasted_iota(jnp.int32, (nr, tile_b), 0)
    onehot = (rel_iota == ids_ref[...]).astype(jnp.float32)     # (NR, TILE_B)
    out_ref[...] = jnp.sum(s * onehot, axis=0, keepdims=True)   # (1, TILE_B)


def transr_score_pallas(d_aug_t, rel_ids, rel_table, *, num_relations, r_pad,
                        tile_b=512):
    """d_aug_t: (K_pad, B) bf16; rel_ids: (B,) int; rel_table: (NR*R_pad, K_pad) bf16."""
    k_pad, B = d_aug_t.shape
    rows, k_pad_b = rel_table.shape
    assert k_pad_b == k_pad and rows == num_relations * r_pad

    # Cap TILE_B so the per-step f32 matmul result (rows x TILE_B) stays ~<=32 vregs.
    max_tile = max(128, (32768 // max(rows, 1)) // 128 * 128)
    tile_b = min(tile_b, max_tile)

    # Enforce >=128 lanes (unmasked vector stores) and lane-dense multiples of 128.
    if B <= tile_b:
        tile_b = max(128, _round_up(B, 128))
    assert tile_b % 128 == 0
    B_pad = _round_up(B, tile_b)

    if B_pad != B:
        d_aug_t = jnp.pad(d_aug_t, ((0, 0), (0, B_pad - B)))
        rel_ids = jnp.pad(rel_ids, (0, B_pad - B), constant_values=-1)  # never matches
    ids2d = rel_ids.astype(jnp.int32).reshape(1, B_pad)

    grid = (B_pad // tile_b,)

    kernel = functools.partial(_transr_kernel, nr=num_relations, r_pad=r_pad)

    out = pl.pallas_call(
        kernel,
        out_shape=jax.ShapeDtypeStruct((1, B_pad), jnp.float32),
        grid_spec=pltpu.PrefetchScalarGridSpec(
            num_scalar_prefetch=0,
            grid=grid,
            in_specs=[
                # (h-t)^T tile, one DMA per batch tile.
                pl.BlockSpec((k_pad, tile_b), lambda i: (0, i)),
                # per-sample relation ids, lane-dense.
                pl.BlockSpec((1, tile_b), lambda i: (0, i)),
                # whole augmented relation table, block index constant across the
                # grid -> DMAed once and kept resident in VMEM.
                pl.BlockSpec((rows, k_pad), lambda i: (0, 0)),
            ],
            out_specs=pl.BlockSpec((1, tile_b), lambda i: (0, i)),
        ),
        compiler_params=pltpu.CompilerParams(
            dimension_semantics=("parallel",),
            # Headroom below v7x's 64 MiB physical VMEM; not binding at demo sizes.
            vmem_limit_bytes=48 * 1024 * 1024,
        ),
    )(d_aug_t, ids2d, rel_table)
    return out[0, :B]


def xavier_uniform(key, shape):
    fan_in, fan_out = shape[0], shape[1]
    bound = jnp.sqrt(6.0 / (fan_in + fan_out))
    return jax.random.uniform(key, shape, minval=-bound, maxval=bound,
                              dtype=jnp.float32)


class TransRPallas:
    """JAX/Pallas port of the PyTorch TransR module (forward / score only)."""

    def __init__(self, num_entities, num_relations, entity_dim, relation_dim,
                 margin, p_norm=1, key=None):
        assert p_norm == 1, "kernel implements p_norm=1 (module default)"
        self.num_entities = num_entities
        self.num_relations = num_relations
        self.entity_dim = entity_dim
        self.relation_dim = relation_dim
        self.margin = margin
        k1, k2, k3 = jax.random.split(key, 3)
        # f32 master parameters (mirrors the PyTorch module's embeddings).
        self.entity_embeddings = xavier_uniform(k1, (num_entities, entity_dim))
        self.relation_embeddings = xavier_uniform(k2, (num_relations, relation_dim))
        self.relation_transfer = xavier_uniform(
            k3, (num_relations, entity_dim * relation_dim))

        # Precomputed bf16 compute copy:  per-relation [M_r^T | r_r | 0-pad],
        # R padded to a multiple of 8, K = E+1 padded to a multiple of 16,
        # flattened to (NR*R_pad, K_pad) for one resident MXU operand.
        E, R = entity_dim, relation_dim
        self._k_pad = _round_up(E + 1, 16)
        self._r_pad = _round_up(R, 8)
        m_t = jnp.transpose(
            self.relation_transfer.reshape(num_relations, E, R), (0, 2, 1))  # (NR, R, E)
        aug = jnp.concatenate(
            [m_t, self.relation_embeddings[:, :, None]], axis=-1)            # (NR, R, E+1)
        aug = jnp.pad(aug, ((0, 0),
                            (0, self._r_pad - R),
                            (0, self._k_pad - (E + 1))))                     # zero pad
        self._rel_table_bf16 = aug.reshape(
            num_relations * self._r_pad, self._k_pad).astype(jnp.bfloat16)

    def __call__(self, head, relation, tail):
        # Embedding gathers + (h - t) fusion stay in plain JAX (glue).
        head_emb = jnp.take(self.entity_embeddings, head, axis=0)
        tail_emb = jnp.take(self.entity_embeddings, tail, axis=0)
        d = (head_emb - tail_emb).astype(jnp.bfloat16)            # bf16 BEFORE transpose
        B = d.shape[0]
        ones = jnp.ones((1, B), jnp.bfloat16)                     # bias-fold row
        zeros = jnp.zeros((self._k_pad - self.entity_dim - 1, B), jnp.bfloat16)
        d_aug_t = jnp.concatenate([d.T, ones, zeros], axis=0)     # (K_pad, B)
        return transr_score_pallas(d_aug_t, relation, self._rel_table_bf16,
                                   num_relations=self.num_relations,
                                   r_pad=self._r_pad)


def _reference_score_f32(model, head, relation, tail):
    # Exact PyTorch-module semantics in f32 (two projections, no fusion).
    head_emb = jnp.take(model.entity_embeddings, head, axis=0)
    tail_emb = jnp.take(model.entity_embeddings, tail, axis=0)
    rel_emb = jnp.take(model.relation_embeddings, relation, axis=0)
    rel_mat = jnp.take(model.relation_transfer, relation, axis=0).reshape(
        -1, model.entity_dim, model.relation_dim)
    hp = jnp.einsum('be,ber->br', head_emb, rel_mat,
                    precision=jax.lax.Precision.HIGHEST)
    tp = jnp.einsum('be,ber->br', tail_emb, rel_mat,
                    precision=jax.lax.Precision.HIGHEST)
    return jnp.sum(jnp.abs(hp + rel_emb - tp), axis=-1)


def _reference_score_matched(model, head, relation, tail):
    # Same math as the kernel: fused (h-t) @ [M | r], bf16 inputs, f32 accumulation.
    head_emb = jnp.take(model.entity_embeddings, head, axis=0)
    tail_emb = jnp.take(model.entity_embeddings, tail, axis=0)
    d = (head_emb - tail_emb).astype(jnp.bfloat16).astype(jnp.float32)
    d1 = jnp.concatenate([d, jnp.ones((d.shape[0], 1), jnp.float32)], axis=-1)
    aug = model._rel_table_bf16.astype(jnp.float32).reshape(
        model.num_relations, model._r_pad, model._k_pad)[:, :, :model.entity_dim + 1]
    aug = jnp.take(aug, relation, axis=0)                          # (B, R_pad, E+1)
    proj = jnp.einsum('brk,bk->br', aug, d1, precision=jax.lax.Precision.HIGHEST)
    return jnp.sum(jnp.abs(proj), axis=-1)


if __name__ == "__main__":
    key = jax.random.PRNGKey(0)
    k_model, k_h, k_r, k_t = jax.random.split(key, 4)

    num_entities, num_relations = 64, 8
    entity_dim, relation_dim = 32, 16
    batch = 16

    model = TransRPallas(num_entities, num_relations, entity_dim, relation_dim,
                         margin=1.0, p_norm=1, key=k_model)

    head = jax.random.randint(k_h, (batch,), 0, num_entities)
    relation = jax.random.randint(k_r, (batch,), 0, num_relations)
    tail = jax.random.randint(k_t, (batch,), 0, num_entities)

    score = jax.block_until_ready(model(head, relation, tail))
    assert score.shape == (batch,)

    # Tight check vs a reference computed at the same (bf16-input, f32-acc) precision.
    ref_matched = _reference_score_matched(model, head, relation, tail)
    assert jnp.allclose(score, ref_matched, atol=5e-3, rtol=5e-3)

    # Loose check vs the original full-f32 TransR formula (bf16 input rounding only).
    ref_f32 = _reference_score_f32(model, head, relation, tail)
    assert jnp.allclose(score, ref_f32, atol=5e-2, rtol=5e-2)

    print("KERNEL_OK")
</pallas_src>

<mosaic_0001>
module attributes {stable_mosaic.version = 11 : i64} {
  func.func @_transr_kernel(%arg0: i32, %arg1: memref<48x128xbf16, #tpu.memory_space<vmem>>, %arg2: memref<1x128xi32, #tpu.memory_space<vmem>>, %arg3: memref<128x48xbf16, #tpu.memory_space<vmem>>, %arg4: memref<1x128xf32, #tpu.memory_space<vmem>>) attributes {dimension_semantics = [#tpu.dimension_semantics<parallel>], iteration_bounds = array<i64: 1>, scalar_prefetch = 0 : i64, scratch_operands = 0 : i64, tpu.core_type = #tpu.core_type<tc>, window_params = [{transform_indices = @transform_0, window_bounds = array<i64: 48, 128>}, {transform_indices = @transform_1, window_bounds = array<i64: 1, 128>}, {pipeline_mode = #tpu.pipeline_mode<synchronous>, transform_indices = @transform_2, window_bounds = array<i64: 128, 48>}, {transform_indices = @transform_3, window_bounds = array<i64: 1, 128>}]} {
    %c0 = arith.constant 0 : index
    %c0_0 = arith.constant 0 : index
    %0 = vector.load %arg3[%c0, %c0_0] : memref<128x48xbf16, #tpu.memory_space<vmem>>, vector<128x48xbf16>
    %c0_1 = arith.constant 0 : index
    %c0_2 = arith.constant 0 : index
    %1 = vector.load %arg1[%c0_1, %c0_2] : memref<48x128xbf16, #tpu.memory_space<vmem>>, vector<48x128xbf16>
    %cst = arith.constant dense<0.000000e+00> : vector<128x128xf32>
    %2 = tpu.matmul %0, %1, %cst {dimension_numbers = #tpu.dot_dimension_numbers<[1], [0], [0], [1], [0, 0, 1, 1], [], []>} : vector<128x48xbf16>, vector<48x128xbf16>, vector<128x128xf32> -> vector<128x128xf32>
    %3 = math.absf %2 : vector<128x128xf32>
    %4 = vector.shape_cast %3 : vector<128x128xf32> to vector<8x16x128xf32>
    %cst_3 = arith.constant dense<0.000000e+00> : vector<8x128xf32>
    %5 = vector.multi_reduction <add>, %4, %cst_3 [1] : vector<8x16x128xf32> to vector<8x128xf32>
    %6 = tpu.iota {dimensions = array<i32: 0>} : vector<8x128xi32>
    %c0_4 = arith.constant 0 : index
    %c0_5 = arith.constant 0 : index
    %7 = vector.load %arg2[%c0_4, %c0_5] : memref<1x128xi32, #tpu.memory_space<vmem>>, vector<1x128xi32>
    %8 = vector.broadcast %7 : vector<1x128xi32> to vector<8x128xi32>
    %9 = arith.cmpi eq, %6, %8 : vector<8x128xi32>
    %10 = arith.extui %9 : vector<8x128xi1> to vector<8x128xi32>
    %11 = arith.sitofp %10 : vector<8x128xi32> to vector<8x128xf32>
    %12 = arith.mulf %5, %11 : vector<8x128xf32>
    %cst_6 = arith.constant dense<0.000000e+00> : vector<128xf32>
    %13 = vector.multi_reduction <add>, %12, %cst_6 [0] : vector<8x128xf32> to vector<128xf32>
    %14 = vector.shape_cast %13 : vector<128xf32> to vector<1x128xf32>
    %c0_7 = arith.constant 0 : index
    %c0_8 = arith.constant 0 : index
    %15 = vector.load %arg4[%c0_7, %c0_8] : memref<1x128xf32, #tpu.memory_space<vmem>>, vector<1x128xf32>
    tpu.vector_store %arg4[%c0_7, %c0_8], %14 {strides = array<i32>} : memref<1x128xf32, #tpu.memory_space<vmem>>, vector<1x128xf32>,
    return
  }
  func.func @transform_0(%arg0: i32) -> (i32, i32) {
    %c0_i32 = arith.constant 0 : i32
    %c0_i32_0 = arith.constant 0 : i32
    return %c0_i32, %arg0 : i32, i32
  }
  func.func @transform_1(%arg0: i32) -> (i32, i32) {
    %c0_i32 = arith.constant 0 : i32
    %c0_i32_0 = arith.constant 0 : i32
    return %c0_i32, %arg0 : i32, i32
  }
  func.func @transform_2(%arg0: i32) -> (i32, i32) {
    %c0_i32 = arith.constant 0 : i32
    %c0_i32_0 = arith.constant 0 : i32
    %c0_i32_1 = arith.constant 0 : i32
    return %c0_i32, %c0_i32_0 : i32, i32
  }
  func.func @transform_3(%arg0: i32) -> (i32, i32) {
    %c0_i32 = arith.constant 0 : i32
    %c0_i32_0 = arith.constant 0 : i32
    return %c0_i32, %arg0 : i32, i32
  }
}

</mosaic_0001>

<bundles_post_ra>
// kernel: tpu_custom_call.1
= control target key start
LH: loop header
LB: loop body
LE: loop exit
PB: predicated region body
PF: predicated region fallthrough
CT: control target
= control target key end

     0   :  { %vm96_vm0 = vcmask 392192   ;;  %s540_s0 = inlined_call_operand.vmem [shape: bf16[48,128], index: 0, kind: input, shape index: {}]   ;;  %s541_s1 = inlined_call_operand.vmem [shape: s32[1,128], index: 1, kind: input, shape index: {}]   ;;  %s542_s2 = inlined_call_operand.vmem [shape: bf16[128,48], index: 2, kind: input, shape index: {}]   ;;  %s543_s3 = inlined_call_operand.hbm [shape: f32[1,128], index: 3, kind: output, shape index: {}]  }
   0x1   :  { %v437_v0 = vld [vmem:[%s540_s0 + $0x10] sm:$0xff]   ;;  %v438_v1 = vld [vmem:[%s540_s0 + $0x8] sm:$0xff]   ;;  %v439_v2 = vld [vmem:[%s540_s0] sm:$0xff]  }
   0x2   :  { %407 = vmatprep.subr.bf16.mxu0 %v437_v0  ;;  %429 = vmatprep.subr.bf16.mxu1 %v437_v0  ;;  %v440_v3 = vld [vmem:[%s542_s2] sm:$0xff]   ;;  %v442_v5 = vld [vmem:[%s542_s2 + $0x8] sm:$0xff]   ;;  %v444_v7 = vld [vmem:[%s542_s2 + $0x10] sm:$0xff]  }
   0x3   :  { %408 = vmatpush3.bf16.msra.mxu0 %v437_v0  ;;  %432 = vmatpush3.bf16.msra.mxu1 %v437_v0  ;;  %v441_v4 = vld [vmem:[%s542_s2 + $0x20] sm:$0xff]   ;;  %v443_v6 = vld [vmem:[%s542_s2 + $0x28] sm:$0xff]   ;;  %v445_v8 = vld [vmem:[%s542_s2 + $0x30] sm:$0xff]  }
   0x4   :  { %409 = vmatprep.subr.bf16.mxu0 %v438_v1  ;;  %430 = vmatprep.subr.bf16.mxu1 %v438_v1 }
   0x5   :  { %413 = vmatprep.mubr.msk.bf16.mxu0 %vm96_vm0, %v440_v3  ;;  %421 = vmatprep.mubr.msk.bf16.mxu1 %vm96_vm0, %v441_v4 }
   0x7   :  { %410 = vmatpush3.bf16.msra.mxu0 %v438_v1  ;;  %433 = vmatpush3.bf16.msra.mxu1 %v438_v1 }
   0x8   :  { %411 = vmatprep.subr.bf16.mxu0 %v439_v2  ;;  %431 = vmatprep.subr.bf16.mxu1 %v439_v2 }
   0xb   :  { %412 = vmatpush3.bf16.msra.mxu0 %v439_v2  ;;  %434 = vmatpush3.bf16.msra.mxu1 %v439_v2 }
   0xc   :  { %8 = vsyncpa [#allocation3], 0  ;;  %v446_v9 = vld [vmem:[%s542_s2 + $0x18] sm:$0xff]   ;;  %v290_v23 = vlaneseq  ;;  %v394_v40 = vld [vmem:[%s541_s1] ss:$0 sm:$0xff]  ;;  %vm333_vm2 = vcmask 1041409  }
   0xd   :  { %v447_v10 = vld [vmem:[%s542_s2 + $0x38] sm:$0xff]   ;;  %vm336_vm3 = vcmask 1042434   ;;  %vm339_vm4 = vcmask 1043459   ;;  %vm342_vm5 = vcmask 1044484   ;;  %vm345_vm6 = vcmask 1045509   ;;  %s471_s1 = smov [#allocation2]  }
   0xe   :  { %414 = vmatmul.mubr.msk.bf16.vlgmr.msra.gmra.mxu0 %vm96_vm0, %v442_v5  ;;  %422 = vmatmul.mubr.msk.bf16.vlgmr.msra.gmra.mxu1 %vm96_vm0, %v443_v6  ;;  %v291_v36 = vshrl.u32 %v290_v23, 7  ;;  %v470_v6 = vmov 0.0   ;;  %vm348_vm7 = vcmask 1046534   ;;  %vm351_vm8 = vcmask 1047559   ;;  %s367_s7 = sshll.u32 %s471_s1, 4  ;;  %s368_s7 = int_to_ptr.vmem [resolvable:$true] %s367_s7 }
   0xf   :  { %417 = vmatprep.mubr.msk.bf16.mxu0 %vm96_vm0, %v444_v7  ;;  %425 = vmatprep.mubr.msk.bf16.mxu1 %vm96_vm0, %v445_v8  ;;  %s448_s8 = scalar_lea.vmem %s368_s7, 16  ;;  %s452_s9 = scalar_lea.vmem %s368_s7, 32 }
  0x10   :  { %vm297_vm1 = vcmp.eq.s32.totalorder %v291_v36, %v394_v40  ;;  %p449_p0 = scmp.ne.s32.totalorder %s368_s7, %s448_s8  ;;  %p453_p1 = scmp.lt.s32.totalorder %s368_s7, %s368_s7 }
  0x11   :  { %v395_v7 = vsel %vm297_vm1, 1.0, %v470_v6  ;;  %p454_p2 = scmp.lt.s32.totalorder %s452_s9, %s448_s8 }
  0x12   :  { %v302_v36 = vrot.slane %v395_v7, 2 }
  0x13   :  { %p455_p3 = por %p454_p2, %p453_p1 }
  0x15   :  { %p456_p4 = pnand %p455_p3, %p449_p0 }
  0x16   :  { %418 = vmatmul.mubr.msk.bf16.gmra.mxu0 %vm96_vm0, %v446_v9  ;;  %426 = vmatmul.mubr.msk.bf16.gmra.mxu1 %vm96_vm0, %v447_v10 }
  0xce   :  { %v415_v11 = vpop.f32.mrf.mxu0  ;;  %v423_v12 = vpop.f32.mrf.mxu1 }
  0xcf   :  { %v228_v15 = vand.u32 2147483647, %v423_v12  ;;  %v220_v18 = vand.u32 2147483647, %v415_v11 }
  0xd0   :  { %v155_v13 = vpop.f32.mrf.mxu0  ;;  %v187_v14 = vpop.f32.mrf.mxu1 }
  0xd1   :  { %v218_v21 = vand.u32 2147483647, %v155_v13  ;;  %v226_v22 = vand.u32 2147483647, %v187_v14 }
  0xd2   :  { %v416_v16 = vpop.f32.mrf.mxu0  ;;  %v424_v17 = vpop.f32.mrf.mxu1 }
  0xd3   :  { %v221_v19 = vand.u32 2147483647, %v416_v16  ;;  %v229_v20 = vand.u32 2147483647, %v424_v17 }
  0xd4   :  { %v158_v24 = vpop.f32.mrf.mxu0  ;;  %v190_v25 = vpop.f32.mrf.mxu1 }
  0xd5   :  { %v241_v26 = vadd.f32 %v221_v19, %v220_v18  ;;  %v269_v27 = vadd.f32 %v229_v20, %v228_v15  ;;  %v219_v28 = vand.u32 2147483647, %v158_v24  ;;  %v227_v29 = vand.u32 2147483647, %v190_v25 }
  0xd6   :  { %v419_v30 = vpop.f32.mrf.mxu0  ;;  %v427_v31 = vpop.f32.mrf.mxu1  ;;  %v301_v20 = vrot.slane %v395_v7, 1 }
  0xd7   :  { %v242_v32 = vrot.slane %v241_v26, 4  ;;  %v270_v33 = vrot.slane %v269_v27, 4  ;;  %v234_v34 = vadd.f32 %v219_v28, %v218_v21  ;;  %v262_v35 = vadd.f32 %v227_v29, %v226_v22 }
  0xd8   :  { %v171_v37 = vpop.f32.mrf.mxu0  ;;  %v203_v38 = vpop.f32.mrf.mxu1  ;;  %v224_v43 = vand.u32 2147483647, %v419_v30  ;;  %v232_v44 = vand.u32 2147483647, %v427_v31  ;;  %v304_v28 = vrot.slane %v395_v7, 4  ;;  %v303_v30 = vrot.slane %v395_v7, 3 }
  0xd9   :  { %v243_v39 = vadd.f32 %v242_v32, %v241_v26  ;;  %v235_v41 = vrot.slane %v234_v34, 4  ;;  %v263_v42 = vrot.slane %v262_v35, 4  ;;  %v271_v48 = vadd.f32 %v270_v33, %v269_v27 }
  0xda   :  { %v420_v45 = vpop.f32.mrf.mxu0  ;;  %v428_v46 = vpop.f32.mrf.mxu1  ;;  %v222_v51 = vand.u32 2147483647, %v171_v37  ;;  %v230_v59 = vand.u32 2147483647, %v203_v38 }
  0xdb   :  { %v244_v47 = vrot.slane %v243_v39, 2  ;;  %v236_v49 = vadd.f32 %v235_v41, %v234_v34  ;;  %v264_v50 = vadd.f32 %v263_v42, %v262_v35  ;;  %v225_v52 = vand.u32 2147483647, %v420_v45 }
  0xdc   :  { %v233_v53 = vand.u32 2147483647, %v428_v46  ;;  %v174_v54 = vpop.f32.mrf.mxu0  ;;  %v206_v55 = vpop.f32.mrf.mxu1  ;;  %v272_v0 = vrot.slane %v271_v48, 2  ;;  %v305_v42 = vrot.slane %v395_v7, 5  ;;  %v306_v46 = vrot.slane %v395_v7, 6 }
  0xdd   :  { %v245_v56 = vadd.f32 %v244_v47, %v243_v39  ;;  %v237_v57 = vrot.slane %v236_v49, 2  ;;  %v265_v58 = vrot.slane %v264_v50, 2  ;;  %v255_v60 = vadd.f32 %v225_v52, %v224_v43 }
  0xde   :  { %v283_v61 = vadd.f32 %v233_v53, %v232_v44  ;;  %v223_v62 = vand.u32 2147483647, %v174_v54  ;;  %v231_v63 = vand.u32 2147483647, %v206_v55  ;;  %v273_v14 = vadd.f32 %v272_v0, %v271_v48 }
  0xdf   :  { %v256_v1 = vrot.slane %v255_v60, 4  ;;  %v246_v5 = vrot.slane %v245_v56, 1  ;;  %v238_v8 = vadd.f32 %v237_v57, %v236_v49  ;;  %v266_v9 = vadd.f32 %v265_v58, %v264_v50 }
  0xe0   :  { %v284_v2 = vrot.slane %v283_v61, 4  ;;  %v248_v3 = vadd.f32 %v223_v62, %v222_v51  ;;  %v276_v4 = vadd.f32 %v231_v63, %v230_v59  ;;  %v274_v27 = vrot.slane %v273_v14, 1 }
  0xe1   :  { %v257_v10 = vadd.f32 %v256_v1, %v255_v60  ;;  %v247_v19 = vadd.f32 %v246_v5, %v245_v56  ;;  %v239_v21 = vrot.slane %v238_v8, 1  ;;  %v267_v22 = vrot.slane %v266_v9, 1 }
  0xe2   :  { %v285_v11 = vadd.f32 %v284_v2, %v283_v61  ;;  %v249_v12 = vrot.slane %v248_v3, 4  ;;  %v277_v13 = vrot.slane %v276_v4, 4  ;;  %v275_v41 = vadd.f32 %v274_v27, %v273_v14 }
  0xe3   :  { %v258_v15 = vrot.slane %v257_v10, 2  ;;  %v317_v33 = vmul.f32 %v301_v20, %v247_v19  ;;  %v240_v34 = vadd.f32 %v239_v21, %v238_v8  ;;  %v268_v37 = vadd.f32 %v267_v22, %v266_v9 }
  0xe4   :  { %v286_v16 = vrot.slane %v285_v11, 2  ;;  %v250_v17 = vadd.f32 %v249_v12, %v248_v3  ;;  %v278_v18 = vadd.f32 %v277_v13, %v276_v4  ;;  %v307_v43 = vrot.slane %v395_v7, 7 }
  0xe5   :  { %v259_v23 = vadd.f32 %v258_v15, %v257_v10  ;;  %v332_v47 = vrot.slane %v317_v33, 7  ;;  %v316_v48 = vmul.f32 %v395_v7, %v240_v34  ;;  %v320_v51 = vmul.f32 %v304_v28, %v268_v37 }
  0xe6   :  { %v287_v24 = vadd.f32 %v286_v16, %v285_v11  ;;  %v251_v25 = vrot.slane %v250_v17, 2  ;;  %v279_v26 = vrot.slane %v278_v18, 2  ;;  %v321_v53 = vmul.f32 %v305_v42, %v275_v41 }
  0xe7   :  { %v260_v29 = vrot.slane %v259_v23, 1  ;;  %v334_v56 = vsel %vm333_vm2, %v332_v47, %v316_v48  ;;  %v341_v59 = vrot.slane %v320_v51, 4 }
  0xe8   :  { %v252_v31 = vadd.f32 %v251_v25, %v250_v17  ;;  %v280_v32 = vadd.f32 %v279_v26, %v278_v18  ;;  %v288_v35 = vrot.slane %v287_v24, 1  ;;  %v344_v61 = vrot.slane %v321_v53, 3 }
  0xe9   :  { %v261_v38 = vadd.f32 %v260_v29, %v259_v23 }
  0xea   :  { %v253_v39 = vrot.slane %v252_v31, 1  ;;  %v281_v40 = vrot.slane %v280_v32, 1  ;;  %v289_v50 = vadd.f32 %v288_v35, %v287_v24 }
  0xeb   :  { %v319_v49 = vmul.f32 %v303_v30, %v261_v38 }
  0xec   :  { %v254_v44 = vadd.f32 %v253_v39, %v252_v31  ;;  %v282_v45 = vadd.f32 %v281_v40, %v280_v32  ;;  %v323_v58 = vmul.f32 %v307_v43, %v289_v50 }
  0xed   :  { %v338_v57 = vrot.slane %v319_v49, 5 }
  0xee   :  { %v318_v52 = vmul.f32 %v302_v36, %v254_v44  ;;  %v322_v55 = vmul.f32 %v306_v46, %v282_v45  ;;  %v350_v1 = vrot.slane %v323_v58, 1 }
  0xf0   :  { %v335_v54 = vrot.slane %v318_v52, 6  ;;  %v347_v63 = vrot.slane %v322_v55, 2 }
  0xf2   :  { %v337_v60 = vsel %vm336_vm3, %v335_v54, %v334_v56 }
  0xf3   :  { %v340_v62 = vsel %vm339_vm4, %v338_v57, %v337_v60 }
  0xf4   :  { %v343_v0 = vsel %vm342_vm5, %v341_v59, %v340_v62 }
  0xf5   :  { %v346_v2 = vsel %vm345_vm6, %v344_v61, %v343_v0 }
  0xf6   :  { %v349_v3 = vsel %vm348_vm7, %v347_v63, %v346_v2 }
  0xf7   :  { %v352_v4 = vsel %vm351_vm8, %v350_v1, %v349_v3 }
  0xf8   :  { %v354_v5 = vrot.slane %v352_v4, 4 }
  0xfa   :  { %v355_v6 = vadd.f32 %v354_v5, %v352_v4 }
  0xfc   :  { %v356_v7 = vrot.slane %v355_v6, 2 }
  0xfe   :  { %v357_v8 = vadd.f32 %v356_v7, %v355_v6 }
 0x100   :  { %v358_v9 = vrot.slane %v357_v8, 1 }
 0x102   :  { %v359_v10 = vadd.f32 %v358_v9, %v357_v8 }
 0x104   :  { %360 = vst [vmem:[#allocation2] sm:$0x1] %v359_v10 }
 0x105   :  { %459 = shalt.err (!%p456_p4)
}
 0x106   :  { %370 = dma.vmem_to_hbm [thread:$0]  %s368_s7, 16, %s543_s3, [#allocation3]  }
 0x107   :  { %468 = dma.done.wait [#allocation3], 16  }
 0x108   :  { %469 = vsyncadd [#allocation3], 4294967280 }
 0x109   :  { %374 = vsyncpa [#allocation3], 1 }

</bundles_post_ra>
